<compile_context>
chip_gen: v5e
topology: v5e:2x2
jax: 0.10.0
libtpu: 0.0.40
codegen_flags: <defaults>
</compile_context>

<pallas_src>
import jax
import jax.numpy as jnp
from jax.experimental import pallas as pl
from jax.experimental.pallas import tpu as pltpu


def _mlp_kernel(x_ref, w1_ref, b1_ref, w2_ref, b2_ref, w3_ref, b3_ref, o_ref):
    # x_ref: (TILE_M, input_len) in the caller's dtype. Upcast + transpose
    # in-kernel so the whole fused MLP runs on lane-dense [feat, TILE_M] tiles.
    xT = x_ref[...].astype(jnp.float32).T  # (input_len, TILE_M)

    h1 = jnp.dot(w1_ref[...], xT, preferred_element_type=jnp.float32) + b1_ref[...]
    h1 = jnp.maximum(h1, 0.0)

    h2 = jnp.dot(w2_ref[...], h1, preferred_element_type=jnp.float32) + b2_ref[...]
    h2 = jnp.maximum(h2, 0.0)

    out = jnp.dot(w3_ref[...], h2, preferred_element_type=jnp.float32) + b3_ref[...]
    # Dropout(p=0.0) is the identity.
    o_ref[...] = out.astype(o_ref.dtype)


def _round_up(a, b):
    return (a + b - 1) // b * b


def _vmem_bytes(tile, input_len, output_len, in_itemsize, out_itemsize):
    """Rough per-call VMEM footprint (double-buffered blocks + f32 intermediates)."""
    in_buf = 2 * tile * 128 * in_itemsize                  # (tile, 16) pads to 128 lanes
    out_buf = 2 * _round_up(output_len, 8) * tile * out_itemsize
    scratch = 4 * _round_up(input_len, 8) * tile * 4       # xT, h1, h2, out in f32
    weights = 1 << 20                                      # tiny weights/biases + slack
    return in_buf + out_buf + scratch + weights


def _vmem_budget():
    """Generation-aware VMEM budget (fraction of physical capacity)."""
    try:
        cap = pltpu.get_tpu_info().vmem_capacity_bytes
    except Exception:
        cap = 64 << 20  # conservative fallback (v7x-sized)
    return int(cap * 0.7)


def non_periodic_forward(x, params, *, tile_m=32768):
    """x: (..., input_len) -> (..., output_len). Entire MLP runs in one kernel.

    params: (w1, b1, w2, b2, w3, b3) with w* in PyTorch (out, in) orientation and
    b* of shape (out, 1).
    """
    w1, b1, w2, b2, w3, b3 = params
    input_len = w1.shape[1]
    output_len = w3.shape[0]
    assert x.shape[-1] == input_len

    lead_shape = x.shape[:-1]
    m = 1
    for d in lead_shape:
        m *= int(d)
    if m == 0:
        return jnp.zeros((*lead_shape, output_len), x.dtype)

    # Free reshape; stream x in its native dtype (no wrapper astype / transpose / pad).
    x2d = x.reshape(m, input_len)
    in_isz = jnp.dtype(x.dtype).itemsize
    out_isz = in_isz

    # Tile on the row (lane) axis: multiple of 128, no larger than needed.
    m_lanes = _round_up(m, 128)
    tile = max(128, min(_round_up(tile_m, 128), m_lanes))

    # Clamp the tile so the double-buffered footprint fits this generation's VMEM.
    budget = _vmem_budget()
    while tile > 128 and _vmem_bytes(tile, input_len, output_len, in_isz, out_isz) > 0.8 * budget:
        tile = max(128, _round_up(tile // 2, 128))

    # Give both v7x TensorCores work: ensure >= 2 grid steps when M allows it.
    if m_lanes >= 2 * 128 and pl.cdiv(m, tile) < 2:
        tile = max(128, _round_up(pl.cdiv(m_lanes, 2), 128))

    grid = (pl.cdiv(m, tile),)  # Pallas handles the partial edge block; no M padding.

    est = _vmem_bytes(tile, input_len, output_len, in_isz, out_isz)
    vmem_limit = int(min(budget, max(32 << 20, int(est * 1.3) + (8 << 20))))

    in_specs = [
        # Streaming activations: rows (M) on the sublane axis, contiguous HBM reads,
        # double-buffered; transposed to lane-dense [feat, tile] inside the kernel.
        pl.BlockSpec((tile, input_len), lambda i: (i, 0)),
        # Weights / biases: constant block index -> stay VMEM-resident across the grid.
        pl.BlockSpec((input_len, input_len), lambda i: (0, 0)),
        pl.BlockSpec((input_len, 1), lambda i: (0, 0)),
        pl.BlockSpec((input_len, input_len), lambda i: (0, 0)),
        pl.BlockSpec((input_len, 1), lambda i: (0, 0)),
        pl.BlockSpec((output_len, input_len), lambda i: (0, 0)),
        pl.BlockSpec((output_len, 1), lambda i: (0, 0)),
    ]
    out_specs = pl.BlockSpec((output_len, tile), lambda i: (0, i))

    oT = pl.pallas_call(
        _mlp_kernel,
        out_shape=jax.ShapeDtypeStruct((output_len, m), x.dtype),
        grid=grid,
        in_specs=in_specs,
        out_specs=out_specs,
        compiler_params=pltpu.CompilerParams(
            dimension_semantics=("parallel",),
            vmem_limit_bytes=vmem_limit,
        ),
    )(x2d, w1, b1, w2, b2, w3, b3)

    # Single cheap layout pass: [output_len, M] -> [M, output_len] (output is the
    # smaller operand; the kernel already emitted the caller's dtype).
    return oT.T.reshape(*lead_shape, output_len)


def init_params(key, input_len, output_len, dtype=jnp.float32):
    """Deterministic init mimicking nn.Linear's U(-1/sqrt(fan_in), 1/sqrt(fan_in)).

    Weights are stored in PyTorch (out_features, in_features) orientation; biases
    as (out_features, 1) so they broadcast along the lane (M) axis in-kernel.
    """
    ks = jax.random.split(key, 6)

    def linear(kw, kb, fan_in, fan_out):
        bound = 1.0 / (fan_in ** 0.5)
        w = jax.random.uniform(kw, (fan_out, fan_in), dtype, -bound, bound)
        b = jax.random.uniform(kb, (fan_out, 1), dtype, -bound, bound)
        return w, b

    w1, b1 = linear(ks[0], ks[1], input_len, input_len)
    w2, b2 = linear(ks[2], ks[3], input_len, input_len)
    w3, b3 = linear(ks[4], ks[5], input_len, output_len)
    return (w1, b1, w2, b2, w3, b3)


def _reference(x2d, params):
    w1, b1, w2, b2, w3, b3 = params
    h = jnp.maximum(x2d @ w1.T + b1[:, 0], 0.0)
    h = jnp.maximum(h @ w2.T + b2[:, 0], 0.0)
    return h @ w3.T + b3[:, 0]


if __name__ == "__main__":
    key = jax.random.PRNGKey(0)
    k_x, k_p, k_x2 = jax.random.split(key, 3)

    input_len, output_len = 16, 8
    params = init_params(k_p, input_len, output_len)

    # Small case (single grid step): x (batch=2, channels=4, input_len=16).
    batch, channels = 2, 4
    x = jax.random.normal(k_x, (batch, channels, input_len), dtype=jnp.float32)
    out = jax.block_until_ready(non_periodic_forward(x, params))
    ref = _reference(x.reshape(-1, input_len), params).reshape(
        batch, channels, output_len
    )
    assert out.shape == (batch, channels, output_len)
    assert jnp.allclose(out, ref, atol=1e-5, rtol=1e-5)

    # Ragged case: default tile path exercises grid >= 2 with a partial edge block;
    # the explicit tile_m=128 path exercises a 3-step grid.
    x2 = jax.random.normal(k_x2, (3, 100, input_len), dtype=jnp.float32)
    ref2 = _reference(x2.reshape(-1, input_len), params).reshape(3, 100, output_len)
    out2 = jax.block_until_ready(non_periodic_forward(x2, params))
    assert out2.shape == (3, 100, output_len)
    assert jnp.allclose(out2, ref2, atol=1e-5, rtol=1e-5)

    out3 = jax.block_until_ready(non_periodic_forward(x2, params, tile_m=128))
    assert jnp.allclose(out3, ref2, atol=1e-5, rtol=1e-5)

    print("KERNEL_OK")
</pallas_src>

<mosaic_0001>
module attributes {stable_mosaic.version = 11 : i64} {
  func.func @_mlp_kernel(%arg0: i32, %arg1: memref<128x16xf32, #tpu.memory_space<vmem>>, %arg2: memref<16x16xf32, #tpu.memory_space<vmem>>, %arg3: memref<16x1xf32, #tpu.memory_space<vmem>>, %arg4: memref<16x16xf32, #tpu.memory_space<vmem>>, %arg5: memref<16x1xf32, #tpu.memory_space<vmem>>, %arg6: memref<8x16xf32, #tpu.memory_space<vmem>>, %arg7: memref<8x1xf32, #tpu.memory_space<vmem>>, %arg8: memref<8x128xf32, #tpu.memory_space<vmem>>) attributes {dimension_semantics = [#tpu.dimension_semantics<parallel>], iteration_bounds = array<i64: 1>, scalar_prefetch = 0 : i64, scratch_operands = 0 : i64, tpu.core_type = #tpu.core_type<tc>, window_params = [{transform_indices = @transform_0, window_bounds = array<i64: 128, 16>}, {pipeline_mode = #tpu.pipeline_mode<synchronous>, transform_indices = @transform_1, window_bounds = array<i64: 16, 16>}, {pipeline_mode = #tpu.pipeline_mode<synchronous>, transform_indices = @transform_2, window_bounds = array<i64: 16, 1>}, {pipeline_mode = #tpu.pipeline_mode<synchronous>, transform_indices = @transform_3, window_bounds = array<i64: 16, 16>}, {pipeline_mode = #tpu.pipeline_mode<synchronous>, transform_indices = @transform_4, window_bounds = array<i64: 16, 1>}, {pipeline_mode = #tpu.pipeline_mode<synchronous>, transform_indices = @transform_5, window_bounds = array<i64: 8, 16>}, {pipeline_mode = #tpu.pipeline_mode<synchronous>, transform_indices = @transform_6, window_bounds = array<i64: 8, 1>}, {transform_indices = @transform_7, window_bounds = array<i64: 8, 128>}]} {
    %c0 = arith.constant 0 : index
    %c0_0 = arith.constant 0 : index
    %0 = vector.load %arg1[%c0, %c0_0] : memref<128x16xf32, #tpu.memory_space<vmem>>, vector<128x16xf32>
    %1 = tpu.transpose %0, [1, 0] : vector<128x16xf32> -> vector<16x128xf32>
    %c0_1 = arith.constant 0 : index
    %c0_2 = arith.constant 0 : index
    %2 = vector.load %arg2[%c0_1, %c0_2] : memref<16x16xf32, #tpu.memory_space<vmem>>, vector<16x16xf32>
    %cst = arith.constant dense<0.000000e+00> : vector<16x128xf32>
    %3 = tpu.matmul %2, %1, %cst {dimension_numbers = #tpu.dot_dimension_numbers<[1], [0], [0], [1], [0, 0, 1, 1], [], []>} : vector<16x16xf32>, vector<16x128xf32>, vector<16x128xf32> -> vector<16x128xf32>
    %c0_3 = arith.constant 0 : index
    %c0_4 = arith.constant 0 : index
    %4 = vector.load %arg3[%c0_3, %c0_4] : memref<16x1xf32, #tpu.memory_space<vmem>>, vector<16x1xf32>
    %5 = vector.broadcast %4 : vector<16x1xf32> to vector<16x128xf32>
    %6 = arith.addf %3, %5 : vector<16x128xf32>
    %cst_5 = arith.constant 0.000000e+00 : f32
    %7 = vector.broadcast %cst_5 : f32 to vector<16x128xf32>
    %8 = arith.maximumf %6, %7 : vector<16x128xf32>
    %c0_6 = arith.constant 0 : index
    %c0_7 = arith.constant 0 : index
    %9 = vector.load %arg4[%c0_6, %c0_7] : memref<16x16xf32, #tpu.memory_space<vmem>>, vector<16x16xf32>
    %cst_8 = arith.constant dense<0.000000e+00> : vector<16x128xf32>
    %10 = tpu.matmul %9, %8, %cst_8 {dimension_numbers = #tpu.dot_dimension_numbers<[1], [0], [0], [1], [0, 0, 1, 1], [], []>} : vector<16x16xf32>, vector<16x128xf32>, vector<16x128xf32> -> vector<16x128xf32>
    %c0_9 = arith.constant 0 : index
    %c0_10 = arith.constant 0 : index
    %11 = vector.load %arg5[%c0_9, %c0_10] : memref<16x1xf32, #tpu.memory_space<vmem>>, vector<16x1xf32>
    %12 = vector.broadcast %11 : vector<16x1xf32> to vector<16x128xf32>
    %13 = arith.addf %10, %12 : vector<16x128xf32>
    %cst_11 = arith.constant 0.000000e+00 : f32
    %14 = vector.broadcast %cst_11 : f32 to vector<16x128xf32>
    %15 = arith.maximumf %13, %14 : vector<16x128xf32>
    %c0_12 = arith.constant 0 : index
    %c0_13 = arith.constant 0 : index
    %16 = vector.load %arg6[%c0_12, %c0_13] : memref<8x16xf32, #tpu.memory_space<vmem>>, vector<8x16xf32>
    %cst_14 = arith.constant dense<0.000000e+00> : vector<8x128xf32>
    %17 = tpu.matmul %16, %15, %cst_14 {dimension_numbers = #tpu.dot_dimension_numbers<[1], [0], [0], [1], [0, 0, 1, 1], [], []>} : vector<8x16xf32>, vector<16x128xf32>, vector<8x128xf32> -> vector<8x128xf32>
    %c0_15 = arith.constant 0 : index
    %c0_16 = arith.constant 0 : index
    %18 = vector.load %arg7[%c0_15, %c0_16] : memref<8x1xf32, #tpu.memory_space<vmem>>, vector<8x1xf32>
    %19 = vector.broadcast %18 : vector<8x1xf32> to vector<8x128xf32>
    %20 = arith.addf %17, %19 : vector<8x128xf32>
    %c0_17 = arith.constant 0 : index
    %c0_18 = arith.constant 0 : index
    %21 = vector.load %arg8[%c0_17, %c0_18] : memref<8x128xf32, #tpu.memory_space<vmem>>, vector<8x128xf32>
    tpu.vector_store %arg8[%c0_17, %c0_18], %20 {strides = array<i32>} : memref<8x128xf32, #tpu.memory_space<vmem>>, vector<8x128xf32>,
    return
  }
  func.func @transform_0(%arg0: i32) -> (i32, i32) {
    %c0_i32 = arith.constant 0 : i32
    %c0_i32_0 = arith.constant 0 : i32
    return %arg0, %c0_i32 : i32, i32
  }
  func.func @transform_1(%arg0: i32) -> (i32, i32) {
    %c0_i32 = arith.constant 0 : i32
    %c0_i32_0 = arith.constant 0 : i32
    %c0_i32_1 = arith.constant 0 : i32
    return %c0_i32, %c0_i32_0 : i32, i32
  }
  func.func @transform_2(%arg0: i32) -> (i32, i32) {
    %c0_i32 = arith.constant 0 : i32
    %c0_i32_0 = arith.constant 0 : i32
    %c0_i32_1 = arith.constant 0 : i32
    return %c0_i32, %c0_i32_0 : i32, i32
  }
  func.func @transform_3(%arg0: i32) -> (i32, i32) {
    %c0_i32 = arith.constant 0 : i32
    %c0_i32_0 = arith.constant 0 : i32
    %c0_i32_1 = arith.constant 0 : i32
    return %c0_i32, %c0_i32_0 : i32, i32
  }
  func.func @transform_4(%arg0: i32) -> (i32, i32) {
    %c0_i32 = arith.constant 0 : i32
    %c0_i32_0 = arith.constant 0 : i32
    %c0_i32_1 = arith.constant 0 : i32
    return %c0_i32, %c0_i32_0 : i32, i32
  }
  func.func @transform_5(%arg0: i32) -> (i32, i32) {
    %c0_i32 = arith.constant 0 : i32
    %c0_i32_0 = arith.constant 0 : i32
    %c0_i32_1 = arith.constant 0 : i32
    return %c0_i32, %c0_i32_0 : i32, i32
  }
  func.func @transform_6(%arg0: i32) -> (i32, i32) {
    %c0_i32 = arith.constant 0 : i32
    %c0_i32_0 = arith.constant 0 : i32
    %c0_i32_1 = arith.constant 0 : i32
    return %c0_i32, %c0_i32_0 : i32, i32
  }
  func.func @transform_7(%arg0: i32) -> (i32, i32) {
    %c0_i32 = arith.constant 0 : i32
    %c0_i32_0 = arith.constant 0 : i32
    return %c0_i32, %arg0 : i32, i32
  }
}

</mosaic_0001>

<bundles_post_ra>
// kernel: tpu_custom_call.1
= control target key start
LH: loop header
LB: loop body
LE: loop exit
PB: predicated region body
PF: predicated region fallthrough
CT: control target
= control target key end

     0   :  { %12 = vsyncpa [#allocation3], 0  ;;  %s500_s0 = inlined_call_operand.vmem [shape: f32[8,16], index: 0, kind: input, shape index: {}]   ;;  %s501_s1 = inlined_call_operand.vmem [shape: f32[16,16], index: 1, kind: input, shape index: {}]   ;;  %s502_s2 = inlined_call_operand.vmem [shape: f32[16,1], index: 2, kind: input, shape index: {}]   ;;  %s503_s3 = inlined_call_operand.vmem [shape: f32[16,16], index: 3, kind: input, shape index: {}]   ;;  %s504_s4 = inlined_call_operand.vmem [shape: f32[16,1], index: 4, kind: input, shape index: {}]   ;;  %s505_s5 = inlined_call_operand.hbm [shape: f32[8,16], index: 5, kind: input, shape index: {}]   ;;  %s506_s6 = inlined_call_operand.vmem [shape: f32[8,1], index: 6, kind: input, shape index: {}]   ;;  %s507_s7 = inlined_call_operand.hbm [shape: f32[8,8], index: 7, kind: output, shape index: {}]  }
   0x1   :  { %13 = vsyncpa [#allocation4], 0  ;;  %s29_s26 = sshll.u32 %s505_s5, 4  ;;  %s339_s27 = smov [#allocation2]   ;;  %s30_s26 = int_to_ptr.hbm [resolvable:$true] %s29_s26 }
   0x2   :  { %s31_s28 = sshll.u32 %s339_s27, 4  ;;  %s32_s28 = int_to_ptr.vmem [resolvable:$true] %s31_s28 }
   0x3   :  { %34 = dma.hbm_to_vmem [thread:$0]  %s30_s26, 128, %s32_s28, [#allocation3]  }
   0x4   :  { %335 = dma.done.wait [#allocation3], 128  }
   0x5   :  { %336 = vsyncadd [#allocation3], 4294967168  ;;  %vm71_vm0 = vcmask 130048   ;;  %v56_v0 = vld [vmem:[%s500_s0 + $0x78] sm:$0xff]  ;;  %v55_v1 = vld [vmem:[%s500_s0 + $0x70] sm:$0xff]  ;;  %v340_v11 = vmov 0  }
   0x6   :  { %244 = vmatpush.xpose.msk.msra.mxu0 %vm71_vm0, %v56_v0  ;;  %265 = vmatpush.xpose.msk.msra.mxu3 %vm71_vm0, %v56_v0  ;;  %v54_v2 = vld [vmem:[%s500_s0 + $0x68] sm:$0xff]  ;;  %v53_v3 = vld [vmem:[%s500_s0 + $0x60] sm:$0xff]  ;;  %v52_v4 = vld [vmem:[%s500_s0 + $0x58] sm:$0xff] }
   0x7   :  { %v51_v5 = vld [vmem:[%s500_s0 + $0x50] sm:$0xff]  ;;  %v50_v6 = vld [vmem:[%s500_s0 + $0x48] sm:$0xff]  ;;  %v49_v7 = vld [vmem:[%s500_s0 + $0x40] sm:$0xff]  ;;  %284 = vset.pattern.permute.xlu0 %v340_v11  ;;  %285 = vset.pattern.permute.xlu1 %v340_v11 }
   0x8   :  { %v48_v8 = vld [vmem:[%s500_s0 + $0x38] sm:$0xff]  ;;  %v60_v9 = vld [vmem:[%s502_s2 + $0x8] sm:$0xff]  ;;  %v47_v10 = vld [vmem:[%s500_s0 + $0x30] sm:$0xff]  ;;  %286 = vset.pattern.permute.xlu2 %v340_v11 }
   0x9   :  { %68 = vperm.xlu0 %284, %v60_v9   ;;  %v46_v12 = vld [vmem:[%s500_s0 + $0x28] sm:$0xff]  ;;  %v59_v13 = vld [vmem:[%s502_s2] sm:$0xff]  ;;  %v44_v15 = vld [vmem:[%s500_s0 + $0x18] sm:$0xff] }
   0xa   :  { %245 = vmatpush.xpose.msk.msra.mxu0 %vm71_vm0, %v55_v1  ;;  %266 = vmatpush.xpose.msk.msra.mxu3 %vm71_vm0, %v55_v1  ;;  %v45_v14 = vld [vmem:[%s500_s0 + $0x20] sm:$0xff]  ;;  %v43_v16 = vld [vmem:[%s500_s0 + $0x10] sm:$0xff]  ;;  %v42_v17 = vld [vmem:[%s500_s0 + $0x8] sm:$0xff] }
   0xb   :  { %v41_v18 = vld [vmem:[%s500_s0] sm:$0xff]  ;;  %v58_v20 = vld [vmem:[%s501_s1 + $0x8] sm:$0xff] }
   0xc   :  { %v57_v19 = vld [vmem:[%s501_s1] sm:$0xff]  ;;  %v154_v21 = vld [vmem:[%s504_s4 + $0x8] sm:$0xff] }
   0xd   :  { %162 = vperm.xlu1 %285, %v154_v21   ;;  %v153_v22 = vld [vmem:[%s504_s4] sm:$0xff]  ;;  %v152_v32 = vld [vmem:[%s503_s3 + $0x8] sm:$0xff] }
   0xe   :  { %246 = vmatpush.xpose.msk.msra.mxu0 %vm71_vm0, %v54_v2  ;;  %267 = vmatpush.xpose.msk.msra.mxu3 %vm71_vm0, %v54_v2  ;;  %v151_v31 = vld [vmem:[%s503_s3] sm:$0xff]  ;;  %s341_s3 = smov [#allocation5]  }
   0xf   :  { %v197_v33 = vld [vmem:[%s506_s6] sm:$0xff]  ;;  %s232_s27 = sshll.u32 %s341_s3, 4  ;;  %s234_s6 = sshll.u32 %s507_s7, 4  ;;  %s233_s27 = int_to_ptr.vmem [resolvable:$true] %s232_s27  ;;  %s235_s6 = int_to_ptr.hbm [resolvable:$true] %s234_s6 }
  0x10   :  { %200 = vperm.xlu2 %286, %v197_v33   ;;  %v196_v42 = vld [vmem:[#allocation2] sm:$0xff] }
  0x11   :  { %63 = vperm.xlu0 %284, %v59_v13  }
  0x12   :  { %247 = vmatpush.xpose.msk.msra.mxu0 %vm71_vm0, %v53_v3  ;;  %268 = vmatpush.xpose.msk.msra.mxu3 %vm71_vm0, %v53_v3 }
  0x15   :  { %157 = vperm.xlu1 %285, %v153_v22  }
  0x16   :  { %248 = vmatpush.xpose.msk.msra.mxu0 %vm71_vm0, %v52_v4  ;;  %269 = vmatpush.xpose.msk.msra.mxu3 %vm71_vm0, %v52_v4 }
  0x1a   :  { %249 = vmatpush.xpose.msk.msra.mxu0 %vm71_vm0, %v51_v5  ;;  %270 = vmatpush.xpose.msk.msra.mxu3 %vm71_vm0, %v51_v5 }
  0x1e   :  { %250 = vmatpush.xpose.msk.msra.mxu0 %vm71_vm0, %v50_v6  ;;  %271 = vmatpush.xpose.msk.msra.mxu3 %vm71_vm0, %v50_v6 }
  0x22   :  { %251 = vmatpush.xpose.msk.msra.mxu0 %vm71_vm0, %v49_v7  ;;  %272 = vmatpush.xpose.msk.msra.mxu3 %vm71_vm0, %v49_v7 }
  0x26   :  { %252 = vmatpush.xpose.msk.msra.mxu0 %vm71_vm0, %v48_v8  ;;  %273 = vmatpush.xpose.msk.msra.mxu3 %vm71_vm0, %v48_v8 }
  0x2a   :  { %253 = vmatpush.xpose.msk.msra.mxu0 %vm71_vm0, %v47_v10  ;;  %274 = vmatpush.xpose.msk.msra.mxu3 %vm71_vm0, %v47_v10 }
  0x2e   :  { %254 = vmatpush.xpose.msk.msra.mxu0 %vm71_vm0, %v46_v12  ;;  %275 = vmatpush.xpose.msk.msra.mxu3 %vm71_vm0, %v46_v12 }
  0x32   :  { %255 = vmatpush.xpose.msk.msra.mxu0 %vm71_vm0, %v45_v14  ;;  %276 = vmatpush.xpose.msk.msra.mxu3 %vm71_vm0, %v45_v14 }
  0x36   :  { %256 = vmatpush.xpose.msk.msra.mxu0 %vm71_vm0, %v44_v15  ;;  %277 = vmatpush.xpose.msk.msra.mxu3 %vm71_vm0, %v44_v15 }
  0x3a   :  { %257 = vmatpush.xpose.msk.msra.mxu0 %vm71_vm0, %v43_v16  ;;  %278 = vmatpush.xpose.msk.msra.mxu3 %vm71_vm0, %v43_v16 }
  0x3e   :  { %258 = vmatpush.xpose.msk.msra.mxu0 %vm71_vm0, %v42_v17  ;;  %279 = vmatpush.xpose.msk.msra.mxu3 %vm71_vm0, %v42_v17 }
  0x42   :  { %259 = vmatpush.xpose.msk.msra.mxu0 %vm71_vm0, %v41_v18  ;;  %280 = vmatpush.xpose.msk.msra.mxu3 %vm71_vm0, %v41_v18 }
  0x45   :  { %260 = vmatmul.msk.f32.vlgmr.msra.gmra.mxu0 %vm71_vm0, %v57_v19  ;;  %261 = vmatmul.msk.f32.vlgmr.msra.gmra.mxu3 %vm71_vm0, %v58_v20 }
  0x6a   :  { %v201_v43 = vpop.permute.xlu2 %200 }
  0x7b   :  { %v69_v23 = vpop.permute.xlu0 %68 }
  0x7f   :  { %v163_v34 = vpop.permute.xlu1 %162 }
  0x83   :  { %v64_v24 = vpop.permute.xlu0 %63 }
  0x87   :  { %v158_v36 = vpop.permute.xlu1 %157 }
  0xc2   :  { %v143_v25 = vpop.f32.mrf.mxu0 }
  0xc3   :  { %v144_v27 = vadd.f32 %v143_v25, %v64_v24 }
  0xc5   :  { %v149_v30 = vmax.f32 %v144_v27, 0.0 }
  0xc8   :  { %v146_v26 = vpop.f32.mrf.mxu3 }
  0xc9   :  { %v147_v28 = vadd.f32 %v146_v26, %v69_v23 }
  0xcb   :  { %v150_v29 = vmax.f32 %v147_v28, 0.0 }
  0xcd   :  { %185 = vmatpush.msra.mxu1 %v150_v29 }
  0xcf   :  { %186 = vmatpush.msra.mxu1 %v149_v30 }
  0xd0   :  { %262 = vmatmul.msk.f32.vlgmr.msra.gmra.mxu1 %vm71_vm0, %v151_v31 }
  0xd8   :  { %263 = vmatmul.msk.f32.gmra.mxu1 %vm71_vm0, %v152_v32 }
 0x14d   :  { %v188_v35 = vpop.f32.mrf.mxu1 }
 0x14e   :  { %v189_v38 = vadd.f32 %v188_v35, %v158_v36 }
 0x150   :  { %v194_v41 = vmax.f32 %v189_v38, 0.0 }
 0x155   :  { %v191_v37 = vpop.f32.mrf.mxu1 }
 0x156   :  { %v192_v39 = vadd.f32 %v191_v37, %v163_v34 }
 0x158   :  { %v195_v40 = vmax.f32 %v192_v39, 0.0 }
 0x15a   :  { %220 = vmatpush.msra.mxu2 %v195_v40 }
 0x15c   :  { %221 = vmatpush.msra.mxu2 %v194_v41 }
 0x15d   :  { %264 = vmatmul.msk.f32.vlgmr.msra.gmra.mxu2 %vm71_vm0, %v196_v42 }
 0x1e0   :  { %v223_v44 = vpop.f32.mrf.mxu2 }
 0x1e1   :  { %v224_v45 = vadd.f32 %v223_v44, %v201_v43 }
 0x1e3   :  { %226 = vst [vmem:[#allocation5] sm:$0xff] %v224_v45 }
 0x1e4   :  { %237 = dma.vmem_to_hbm [thread:$0]  %s233_s27, 128, %s235_s6, [#allocation4]  }
 0x1e5   :  { %337 = dma.done.wait [#allocation4], 128  }
 0x1e6   :  { %338 = vsyncadd [#allocation4], 4294967168 }
 0x1e7   :  { %242 = vsyncpa [#allocation3], 1 }
 0x1e8   :  { %243 = vsyncpa [#allocation4], 1 }

</bundles_post_ra>
